<compile_context>
chip_gen: v6e
topology: v6e:2x2x1
jax: 0.10.0
libtpu: 0.0.40
codegen_flags: <defaults>
</compile_context>

<pallas_src>
import jax
import jax.numpy as jnp
from jax.experimental import pallas as pl
from jax.experimental.pallas import tpu as pltpu

_LANES = 128
_SUBLANES = 8


def _round_up(n, m):
    return ((n + m - 1) // m) * m


def _risk_classifier_kernel(x_ref, w1_ref, b1_ref, w2_ref, b2_ref, w3_ref, b3_ref, o_ref):
    # One (tb, input_dim) batch tile through the whole MLP.
    # x arrives as f32 and is cast to bf16 on the VPU (hidden under the DMA), so the
    # wrapper never spends an extra HBM pass just to cast it.
    x = x_ref[...].astype(jnp.bfloat16)

    # Layer 1: bf16 MXU matmul, f32 accumulate; bias + ReLU stay f32 (v5e-safe).
    h1 = jnp.dot(x, w1_ref[...], preferred_element_type=jnp.float32) + b1_ref[...]
    h1 = jnp.maximum(h1, 0.0)
    # TODO(synk): Dropout(0.3) is identity in eval mode; training-mode dropout would
    # need pltpu.prng_seed + pltpu.prng_random_bits masking here.

    # Layer 2 (hidden dim zero-padded to 128 lanes in the wrapper -> lane-dense vregs).
    h2 = jnp.dot(h1.astype(jnp.bfloat16), w2_ref[...],
                 preferred_element_type=jnp.float32) + b2_ref[...]
    h2 = jnp.maximum(h2, 0.0)

    # Layer 3: output block is the true (tb, num_classes) width -- tiny masked store,
    # ~32x less HBM writeback than a 128-lane padded f32 output.
    h3 = jnp.dot(h2.astype(jnp.bfloat16), w3_ref[...],
                 preferred_element_type=jnp.float32) + b3_ref[...]
    o_ref[...] = h3.astype(o_ref.dtype)


def risk_classifier_forward(x, params, *, block_b=2048):
    """x: (B, input_dim) float32. params: dict of w1,b1,w2,b2,w3,b3 (weights stored
    (in_features, out_features): kernel computes x @ W + b == PyTorch x @ W.T + b)."""
    w1, b1 = params["w1"], params["b1"]
    w2, b2 = params["w2"], params["b2"]
    w3, b3 = params["w3"], params["b3"]

    B, input_dim = x.shape
    h1_dim = w1.shape[1]                       # 128
    h2_dim = w2.shape[1]                       # 64
    num_classes = w3.shape[1]
    h2_pad = _round_up(h2_dim, _LANES)         # 128: lane-dense hidden for layers 2/3

    # Batch tile: multiple of 8 sublanes, as large as block_b allows, capped so the
    # grid keeps >=4 steps on big batches (fills the pipeline and both v7x TCs).
    tb_cap = _round_up(min(block_b, B), _SUBLANES)
    tb_target = _round_up(pl.cdiv(B, 4), _SUBLANES)
    tb = max(_SUBLANES, min(tb_cap, tb_target))
    grid = (pl.cdiv(B, tb),)                   # partial last tile: OOB rows dropped

    # Tiny one-time weight prep (bf16 MXU operands; zero-pad hidden-2 to 128 lanes).
    w1_b = w1.astype(jnp.bfloat16)
    w2_b = jnp.pad(w2, ((0, 0), (0, h2_pad - h2_dim))).astype(jnp.bfloat16)
    b2_p = jnp.pad(b2, ((0, 0), (0, h2_pad - h2_dim)))                 # f32
    w3_b = jnp.pad(w3, ((0, h2_pad - h2_dim), (0, 0))).astype(jnp.bfloat16)

    const2d = lambda i: (0, 0)   # weights/biases: VMEM-resident across all batch steps

    flops = 2 * B * (input_dim * h1_dim + h1_dim * h2_pad + h2_pad * num_classes)
    bytes_accessed = (x.size * 4 + B * num_classes * 4
                      + w1_b.size * 2 + w2_b.size * 2 + w3_b.size * 2
                      + b1.size * 4 + b2_p.size * 4 + b3.size * 4)
    cost = pl.CostEstimate(flops=flops, transcendentals=0,
                           bytes_accessed=bytes_accessed)

    return pl.pallas_call(
        _risk_classifier_kernel,
        out_shape=jax.ShapeDtypeStruct((B, num_classes), jnp.float32),
        grid=grid,
        in_specs=[
            pl.BlockSpec((tb, input_dim), lambda i: (i, 0)),    # x tile, pipelined
            pl.BlockSpec((input_dim, h1_dim), const2d),
            pl.BlockSpec((1, h1_dim), const2d),
            pl.BlockSpec((h1_dim, h2_pad), const2d),
            pl.BlockSpec((1, h2_pad), const2d),
            pl.BlockSpec((h2_pad, num_classes), const2d),
            pl.BlockSpec((1, num_classes), const2d),
        ],
        out_specs=pl.BlockSpec((tb, num_classes), lambda i: (i, 0)),
        compiler_params=pltpu.CompilerParams(
            dimension_semantics=("parallel",),   # batch axis -> both TCs on v7x
        ),
        cost_estimate=cost,
    )(x, w1_b, b1, w2_b, b2_p, w3_b, b3)


def init_params(key, input_dim, num_classes):
    """Deterministic synthetic init. Weights stored (in_features, out_features)."""
    ks = jax.random.split(key, 6)

    def lin(kw, kb, fan_in, fan_out):
        bound = 1.0 / jnp.sqrt(fan_in)
        w = jax.random.uniform(kw, (fan_in, fan_out), jnp.float32, -bound, bound)
        b = jax.random.uniform(kb, (1, fan_out), jnp.float32, -bound, bound)
        return w, b

    w1, b1 = lin(ks[0], ks[1], input_dim, 128)
    w2, b2 = lin(ks[2], ks[3], 128, 64)
    w3, b3 = lin(ks[4], ks[5], 64, num_classes)
    return {"w1": w1, "b1": b1, "w2": w2, "b2": b2, "w3": w3, "b3": b3}


def reference_forward(x, params):
    """Pure-JAX reference mirroring the kernel's dtype path (bf16 matmul operands,
    f32 accumulation, f32 bias/ReLU) so the comparison is tight."""
    cast = lambda a: a.astype(jnp.bfloat16)
    h1 = jnp.dot(cast(x), cast(params["w1"]),
                 preferred_element_type=jnp.float32) + params["b1"]
    h1 = jnp.maximum(h1, 0.0)
    h2 = jnp.dot(cast(h1), cast(params["w2"]),
                 preferred_element_type=jnp.float32) + params["b2"]
    h2 = jnp.maximum(h2, 0.0)
    return jnp.dot(cast(h2), cast(params["w3"]),
                   preferred_element_type=jnp.float32) + params["b3"]


if __name__ == "__main__":
    key = jax.random.PRNGKey(0)
    k_param, k_x1, k_x2 = jax.random.split(key, 3)

    input_dim, num_classes = 32, 4
    params = init_params(k_param, input_dim, num_classes)

    # Small check (2 full tiles of 8 rows).
    batch = 16
    x = jax.random.normal(k_x1, (batch, input_dim), jnp.float32)
    out = jax.block_until_ready(risk_classifier_forward(x, params))
    ref = reference_forward(x, params)
    assert out.shape == (batch, num_classes)
    assert jnp.allclose(out, ref, atol=2e-3, rtol=2e-3)

    # Multi-tile check with a partial last tile (1000 rows -> 4 tiles of 256,
    # last tile 232 rows; exercises out-of-bounds writeback clipping).
    batch2 = 1000
    x2 = jax.random.normal(k_x2, (batch2, input_dim), jnp.float32)
    out2 = jax.block_until_ready(risk_classifier_forward(x2, params))
    ref2 = reference_forward(x2, params)
    assert out2.shape == (batch2, num_classes)
    assert jnp.allclose(out2, ref2, atol=2e-3, rtol=2e-3)

    print("KERNEL_OK")
</pallas_src>

<mosaic_0001>
module attributes {stable_mosaic.version = 11 : i64} {
  func.func @_risk_classifier_kernel(%arg0: i32, %arg1: memref<8x32xf32, #tpu.memory_space<vmem>>, %arg2: memref<32x128xbf16, #tpu.memory_space<vmem>>, %arg3: memref<1x128xf32, #tpu.memory_space<vmem>>, %arg4: memref<128x128xbf16, #tpu.memory_space<vmem>>, %arg5: memref<1x128xf32, #tpu.memory_space<vmem>>, %arg6: memref<128x4xbf16, #tpu.memory_space<vmem>>, %arg7: memref<1x4xf32, #tpu.memory_space<vmem>>, %arg8: memref<8x4xf32, #tpu.memory_space<vmem>>) attributes {dimension_semantics = [#tpu.dimension_semantics<parallel>], iteration_bounds = array<i64: 2>, scalar_prefetch = 0 : i64, scratch_operands = 0 : i64, tpu.core_type = #tpu.core_type<tc>, window_params = [{transform_indices = @transform_0, window_bounds = array<i64: 8, 32>}, {pipeline_mode = #tpu.pipeline_mode<synchronous>, transform_indices = @transform_1, window_bounds = array<i64: 32, 128>}, {pipeline_mode = #tpu.pipeline_mode<synchronous>, transform_indices = @transform_2, window_bounds = array<i64: 1, 128>}, {pipeline_mode = #tpu.pipeline_mode<synchronous>, transform_indices = @transform_3, window_bounds = array<i64: 128, 128>}, {pipeline_mode = #tpu.pipeline_mode<synchronous>, transform_indices = @transform_4, window_bounds = array<i64: 1, 128>}, {pipeline_mode = #tpu.pipeline_mode<synchronous>, transform_indices = @transform_5, window_bounds = array<i64: 128, 4>}, {pipeline_mode = #tpu.pipeline_mode<synchronous>, transform_indices = @transform_6, window_bounds = array<i64: 1, 4>}, {transform_indices = @transform_7, window_bounds = array<i64: 8, 4>}]} {
    %c0 = arith.constant 0 : index
    %c0_0 = arith.constant 0 : index
    %0 = vector.load %arg1[%c0, %c0_0] : memref<8x32xf32, #tpu.memory_space<vmem>>, vector<8x32xf32>
    %1 = arith.truncf %0 : vector<8x32xf32> to vector<8x32xbf16>
    %c0_1 = arith.constant 0 : index
    %c0_2 = arith.constant 0 : index
    %2 = vector.load %arg2[%c0_1, %c0_2] : memref<32x128xbf16, #tpu.memory_space<vmem>>, vector<32x128xbf16>
    %cst = arith.constant dense<0.000000e+00> : vector<8x128xf32>
    %3 = tpu.matmul %1, %2, %cst {dimension_numbers = #tpu.dot_dimension_numbers<[1], [0], [0], [1], [0, 0, 1, 1], [], []>} : vector<8x32xbf16>, vector<32x128xbf16>, vector<8x128xf32> -> vector<8x128xf32>
    %c0_3 = arith.constant 0 : index
    %c0_4 = arith.constant 0 : index
    %4 = vector.load %arg3[%c0_3, %c0_4] : memref<1x128xf32, #tpu.memory_space<vmem>>, vector<1x128xf32>
    %5 = vector.broadcast %4 : vector<1x128xf32> to vector<8x128xf32>
    %6 = arith.addf %3, %5 : vector<8x128xf32>
    %cst_5 = arith.constant 0.000000e+00 : f32
    %7 = vector.broadcast %cst_5 : f32 to vector<8x128xf32>
    %8 = arith.maximumf %6, %7 : vector<8x128xf32>
    %9 = arith.truncf %8 : vector<8x128xf32> to vector<8x128xbf16>
    %c0_6 = arith.constant 0 : index
    %c0_7 = arith.constant 0 : index
    %10 = vector.load %arg4[%c0_6, %c0_7] : memref<128x128xbf16, #tpu.memory_space<vmem>>, vector<128x128xbf16>
    %cst_8 = arith.constant dense<0.000000e+00> : vector<8x128xf32>
    %11 = tpu.matmul %9, %10, %cst_8 {dimension_numbers = #tpu.dot_dimension_numbers<[1], [0], [0], [1], [0, 0, 1, 1], [], []>} : vector<8x128xbf16>, vector<128x128xbf16>, vector<8x128xf32> -> vector<8x128xf32>
    %c0_9 = arith.constant 0 : index
    %c0_10 = arith.constant 0 : index
    %12 = vector.load %arg5[%c0_9, %c0_10] : memref<1x128xf32, #tpu.memory_space<vmem>>, vector<1x128xf32>
    %13 = vector.broadcast %12 : vector<1x128xf32> to vector<8x128xf32>
    %14 = arith.addf %11, %13 : vector<8x128xf32>
    %cst_11 = arith.constant 0.000000e+00 : f32
    %15 = vector.broadcast %cst_11 : f32 to vector<8x128xf32>
    %16 = arith.maximumf %14, %15 : vector<8x128xf32>
    %17 = arith.truncf %16 : vector<8x128xf32> to vector<8x128xbf16>
    %c0_12 = arith.constant 0 : index
    %c0_13 = arith.constant 0 : index
    %18 = vector.load %arg6[%c0_12, %c0_13] : memref<128x4xbf16, #tpu.memory_space<vmem>>, vector<128x4xbf16>
    %cst_14 = arith.constant dense<0.000000e+00> : vector<8x4xf32>
    %19 = tpu.matmul %17, %18, %cst_14 {dimension_numbers = #tpu.dot_dimension_numbers<[1], [0], [0], [1], [0, 0, 1, 1], [], []>} : vector<8x128xbf16>, vector<128x4xbf16>, vector<8x4xf32> -> vector<8x4xf32>
    %c0_15 = arith.constant 0 : index
    %c0_16 = arith.constant 0 : index
    %20 = vector.load %arg7[%c0_15, %c0_16] : memref<1x4xf32, #tpu.memory_space<vmem>>, vector<1x4xf32>
    %21 = vector.broadcast %20 : vector<1x4xf32> to vector<8x4xf32>
    %22 = arith.addf %19, %21 : vector<8x4xf32>
    %c0_17 = arith.constant 0 : index
    %c0_18 = arith.constant 0 : index
    %23 = vector.load %arg8[%c0_17, %c0_18] : memref<8x4xf32, #tpu.memory_space<vmem>>, vector<8x4xf32>
    tpu.vector_store %arg8[%c0_17, %c0_18], %22 {strides = array<i32>} : memref<8x4xf32, #tpu.memory_space<vmem>>, vector<8x4xf32>,
    return
  }
  func.func @transform_0(%arg0: i32) -> (i32, i32) {
    %c0_i32 = arith.constant 0 : i32
    %c0_i32_0 = arith.constant 0 : i32
    return %arg0, %c0_i32 : i32, i32
  }
  func.func @transform_1(%arg0: i32) -> (i32, i32) {
    %c0_i32 = arith.constant 0 : i32
    %c0_i32_0 = arith.constant 0 : i32
    %c0_i32_1 = arith.constant 0 : i32
    return %c0_i32, %c0_i32_0 : i32, i32
  }
  func.func @transform_2(%arg0: i32) -> (i32, i32) {
    %c0_i32 = arith.constant 0 : i32
    %c0_i32_0 = arith.constant 0 : i32
    %c0_i32_1 = arith.constant 0 : i32
    return %c0_i32, %c0_i32_0 : i32, i32
  }
  func.func @transform_3(%arg0: i32) -> (i32, i32) {
    %c0_i32 = arith.constant 0 : i32
    %c0_i32_0 = arith.constant 0 : i32
    %c0_i32_1 = arith.constant 0 : i32
    return %c0_i32, %c0_i32_0 : i32, i32
  }
  func.func @transform_4(%arg0: i32) -> (i32, i32) {
    %c0_i32 = arith.constant 0 : i32
    %c0_i32_0 = arith.constant 0 : i32
    %c0_i32_1 = arith.constant 0 : i32
    return %c0_i32, %c0_i32_0 : i32, i32
  }
  func.func @transform_5(%arg0: i32) -> (i32, i32) {
    %c0_i32 = arith.constant 0 : i32
    %c0_i32_0 = arith.constant 0 : i32
    %c0_i32_1 = arith.constant 0 : i32
    return %c0_i32, %c0_i32_0 : i32, i32
  }
  func.func @transform_6(%arg0: i32) -> (i32, i32) {
    %c0_i32 = arith.constant 0 : i32
    %c0_i32_0 = arith.constant 0 : i32
    %c0_i32_1 = arith.constant 0 : i32
    return %c0_i32, %c0_i32_0 : i32, i32
  }
  func.func @transform_7(%arg0: i32) -> (i32, i32) {
    %c0_i32 = arith.constant 0 : i32
    %c0_i32_0 = arith.constant 0 : i32
    return %arg0, %c0_i32 : i32, i32
  }
}

</mosaic_0001>

<bundles_post_ra>
// kernel: tpu_custom_call.1
= control target key start
LH: loop header
LB: loop body
LE: loop exit
PB: predicated region body
PF: predicated region fallthrough
CT: control target
= control target key end

     0   :  { %12 = vsyncpa [#allocation3], 0  ;;  %s1195_s0 = inlined_call_operand.hbm [shape: f32[16,32], index: 0, kind: input, shape index: {}]   ;;  %s1196_s1 = inlined_call_operand.hbm [shape: bf16[32,128], index: 1, kind: input, shape index: {}]   ;;  %s1197_s2 = inlined_call_operand.vmem [shape: f32[1,128], index: 2, kind: input, shape index: {}]   ;;  %s1198_s3 = inlined_call_operand.vmem [shape: bf16[128,128], index: 3, kind: input, shape index: {}]   ;;  %s1199_s4 = inlined_call_operand.vmem [shape: f32[1,128], index: 4, kind: input, shape index: {}]   ;;  %s1200_s5 = inlined_call_operand.vmem [shape: bf16[128,4], index: 5, kind: input, shape index: {}]   ;;  %s1201_s6 = inlined_call_operand.vmem [shape: f32[1,4], index: 6, kind: input, shape index: {}]   ;;  %s1202_s7 = inlined_call_operand.vmem [shape: f32[16,4], index: 7, kind: output, shape index: {}]  }
   0x1   :  { %14 = vsyncpa [#allocation3 + $0x1], 0 }
   0x2   :  { %15 = vsyncpa [#allocation5], 0  ;;  %s997_s24 = smov 0   ;;  %s999_s25 = smov 0  }
   0x3   :  { %s1001_s26 = smov 0   ;;  %s1003_s27 = smov 0  }
   0x4 LB: > { %s1016_s28 = sadd.s32 4294967295, %s949_s27   ;;  %p41_p0 = scmp.ne.s32.totalorder %s941_s25, %s937_s24  ;;  %s949_s27 = sphi %s1003_s27, %s1217_s27   ;;  %s945_s26 = sphi %s1001_s26, %s1216_s26   ;;  %s941_s25 = sphi %s999_s25, %s1215_s25   ;;  %s937_s24 = sphi %s997_s24, %s1214_s24  }
   0x5   : > { %p1203_p1 = scmp.eq.s32.totalorder %s1016_s28, 0  ;;  %p683_p2 = scmp.ge.s32.totalorder %s949_s27, 1 }
   0x6   : > { %p204_p3 = scmp.lt.s32.totalorder %s949_s27, 3  ;;  %s951_s8 = smov [#allocation4]  }
   0x7   : > { %p1024_p4 = por %p1203_p1, %p41_p0  ;;  %s216_s9 = sshll.u32 %s951_s8, 4  ;;  %s217_s9 = int_to_ptr.vmem [resolvable:$true] %s216_s9 }
   0x8   : > { %p1028_p5 = pnand %p683_p2, %p204_p3  ;;  %s1041_s11 = sadd.s32 1, %s949_s27  }
   0x9   : > { %s1206_s29 = scalar_select %p1024_p4, 1, 0 }
   0xa   : > { %s1207_s30 = scalar_select %p1028_p5, 1, 0 }
   0xb   : > { %p791_p6 = pneg %p1028_p5  ;;  %s28_s12 = sadd.s32 1, %s945_s26 }
   0xc   : > { %s25_s13 = ssub.s32 %s949_s27, %s1041_s11  ;;  %s868_s14 = scalar_lea.vmem %s217_s9, 256 }
   0xd   : > { %p1036_p7 = pnand %p791_p6, %p1203_p1  ;;  %p869_p9 = scmp.ne.s32.totalorder %s217_s9, %s868_s14 }
   0xe   : > { %p876_p12 = scmp.lt.s32.totalorder %s217_s9, %s217_s9  ;;  %p877_p13 = scmp.lt.s32.totalorder %s868_s14, %s868_s14 }
   0xf   : > { %p859_p8 = pneg %p1036_p7 }
  0x10   : > { %p878_p0 = por %p877_p13, %p876_p12 }
  0x11   : > { %p871_p10 = pnand %p869_p9, %p859_p8 }
  0x13   : > { %p872_p11 = pneg %p871_p10 }
  0x15   : > { %p879_p2 = pnand %p878_p0, %p872_p11 }
  0x17   : > { %882 = shalt.err (!%p879_p2)
}
  0x18   : > { %s952_s15 = smov 64   ;;  %s953_s16 = smov 4  }
  0x19   : > { %794 = dma.hbm_to_vmem [thread:$0]  (!%p1036_p7), %s1196_s1, 256, %s217_s9, [#allocation5], %s952_s15, %s952_s15, %s953_s16  }
  0x1a   : > { %p26_p3 = scmp.eq.s32.totalorder %s25_s13, 0  ;;  %p35_p6 = scmp.ne.s32.totalorder %s945_s26, %s941_s25 }
  0x1b   : > { %p36_p8 = scmp.eq.s32.totalorder %s949_s27, 0  ;;  %p800_p9 = scmp.lt.s32.totalorder %s949_s27, 2 }
  0x1c   : > { %s1058_s19 = scalar_select %p26_p3, %s945_s26, %s28_s12  }
  0x1d   : > { %p37_p10 = por %p36_p8, %p35_p6  ;;  %s245_s20 = sand.u32 1, %s945_s26  }
  0x1e   : > { %s686_s21 = sshll.u32 %s245_s20, 3  ;;  %s687_s22 = sshll.u32 %s949_s27, 7 }
  0x1f   : > { %s1065_s8 = scalar_lea.hbm %s1195_s0, %s687_s22  ;;  %s249_s10 = scalar_lea.vmem [#allocation2], %s686_s21 }
  0x20   : > { %s256_s9 = sshll.u32 %s249_s10, 4  ;;  %p1067_p7 = pnand %p800_p9, %p37_p10  ;;  %s257_s9 = int_to_ptr.vmem [resolvable:$true] %s256_s9 }
  0x21   : > { %s246_s12 = scalar_lea.sflag [#allocation3], %s245_s20  ;;  %s883_s14 = scalar_lea.hbm %s1065_s8, 128 }
  0x22   : > { %p884_p11 = scmp.ne.s32.totalorder %s1065_s8, %s883_s14  ;;  %p885_p12 = pneg %p1067_p7 }
  0x23   : > { %s888_s16 = scalar_lea.hbm %s1195_s0, 256  ;;  %p889_p2 = scmp.lt.s32.totalorder %s1065_s8, %s1195_s0 }
  0x24   : > { %p886_p13 = pnand %p885_p12, %p884_p11  ;;  %p890_p3 = scmp.lt.s32.totalorder %s888_s16, %s883_s14 }
  0x26   : > { %p887_p0 = pneg %p886_p13  ;;  %p891_p6 = por %p890_p3, %p889_p2 }
  0x28   : > { %p892_p8 = pnand %p891_p6, %p887_p0 }
  0x2a   : > { %895 = shalt.err (!%p892_p8)
}
  0x2b   : > { %s896_s21 = scalar_lea.vmem %s257_s9, 128  ;;  %s954_s20 = smov [#allocation2]  }
  0x2c   : > { %p897_p9 = scmp.ne.s32.totalorder %s257_s9, %s896_s21  ;;  %s901_s22 = sshll.u32 %s954_s20, 4  ;;  %s902_s22 = int_to_ptr.vmem [resolvable:$false] %s901_s22 }
  0x2d   : > { %s903_s23 = scalar_lea.vmem %s902_s22, 256  ;;  %p904_p11 = scmp.lt.s32.totalorder %s257_s9, %s902_s22 }
  0x2e   : > { %p899_p10 = pnand %p897_p9, %p885_p12  ;;  %p905_p13 = scmp.lt.s32.totalorder %s903_s23, %s896_s21 }
  0x30   : > { %p900_p1 = pneg %p899_p10  ;;  %p906_p4 = por %p905_p13, %p904_p11 }
  0x32   : > { %p907_p5 = pnand %p906_p4, %p900_p1 }
  0x34   : > { %910 = shalt.err (!%p907_p5)
}
  0x35   : > { %798 = dma.hbm_to_vmem [thread:$0]  (!%p1067_p7), %s1065_s8, 128, %s257_s9, %s246_s12  }
  0x36   : > { %p1210_p0 = scmp.ne.s32.totalorder %s1207_s30, 0 }
  0x37   : > { %s267_s24 = sand.u32 (!%p1210_p0), 1, %s941_s25   ;;  %p1211_p12 = scmp.ne.s32.totalorder (!%p1210_p0), %s1206_s29, 0 }
  0x38   : > { %265 = sbr.rel (%p1210_p0) target bundleno = 672 (0x2a0), region = 48  ;;  %s689_s10 = sshll.u32 (!%p1210_p0), %s267_s24, 3 }
  0x39   : > { %s268_s14 = scalar_lea.sflag (!%p1210_p0), [#allocation3], %s267_s24  ;;  %s271_s27 = scalar_lea.vmem (!%p1210_p0), [#allocation2], %s689_s10 }
  0x3d   : > { %928 = dma.done.wait (%p1211_p12), %s268_s14, 128  }
  0x3e   : > { %930 = vsyncadd (%p1211_p12), %s268_s14, 4294967168  ;;  %p1212_p1 = scmp.eq.s32.totalorder %s1016_s28, 0 }
  0x40   : > { %932 = dma.done.wait (%p1212_p1), [#allocation5], 256   ;;  %p1213_p4 = pmov %p1212_p1 }
  0x41   : > { %v955_v0 = vmov 0.0   ;;  %vm956_vm0 = vmmov 0   ;;  %v839_v1 = vld [vmem:[#allocation4 + $0x8] sm:$0xff]   ;;  %v840_v2 = vld [vmem:[#allocation4] sm:$0xff]   ;;  %v310_v3 = vld [vmem:[%s271_s27] sm:$0xff]  ;;  %vm335_vm1 = vcmask 261120  }
  0x42   : > { %934 = vsyncadd (%p1213_p4), [#allocation5], 4294967040  ;;  %737 = vmatprep.subr.bf16.mxu0 %v955_v0  ;;  %741 = vmatprep.mubr.msk.bf16.mxu0 %vm956_vm0, %v955_v0  ;;  %v841_v4 = vld [vmem:[%s1198_s3 + $0x38] sm:$0xff]   ;;  %v311_v5 = vpack.c.bf16 %v310_v3, %v310_v3  ;;  %v842_v6 = vld [vmem:[%s1198_s3 + $0x30] sm:$0xff]   ;;  %p305_p5 = scmp.lt.s32.totalorder %s1016_s28, 1  ;;  %vm605_vm2 = vcmask 31744  }
  0x43   : > { %745 = vmatprep.subr.bf16.mxu1 %v955_v0  ;;  %761 = vmatprep.mubr.msk.bf16.mxu1 %vm956_vm0, %v955_v0  ;;  %v843_v7 = vld [vmem:[%s1198_s3 + $0x28] sm:$0xff]   ;;  %v844_v8 = vld [vmem:[%s1198_s3 + $0x20] sm:$0xff]   ;;  %v845_v9 = vld [vmem:[%s1198_s3 + $0x18] sm:$0xff]  }
  0x44   : > { %738 = vmatpush3.bf16.msra.mxu0 %v839_v1  ;;  %746 = vmatpush3.bf16.msra.mxu1 %v841_v4  ;;  %v846_v10 = vld [vmem:[%s1198_s3 + $0x10] sm:$0xff]   ;;  %v847_v11 = vld [vmem:[%s1198_s3 + $0x8] sm:$0xff]   ;;  %v848_v12 = vld [vmem:[%s1198_s3] sm:$0xff]   ;;  %s1219_s28 = smov (!%p305_p5, %s1016_s28), 1 }
  0x45   : > { %739 = vmatprep.subr.bf16.mxu0 %v955_v0  ;;  %747 = vmatprep.subr.bf16.mxu1 %v955_v0  ;;  %v849_v13 = vld [vmem:[%s1200_s5 + $0x38] sm:$0xff]   ;;  %v850_v14 = vld [vmem:[%s1200_s5 + $0x30] sm:$0xff]   ;;  %v851_v15 = vld [vmem:[%s1200_s5 + $0x28] sm:$0xff]   ;;  %s691_s29 = sshll.u32 %s1219_s28, 3 }
  0x46   : > { %v852_v16 = vld [vmem:[%s1200_s5 + $0x20] sm:$0xff]   ;;  %v853_v17 = vld [vmem:[%s1200_s5 + $0x18] sm:$0xff]   ;;  %v854_v18 = vld [vmem:[%s1200_s5 + $0x10] sm:$0xff]   ;;  %s308_s12 = scalar_lea.vmem %s1202_s7, %s691_s29 }
  0x47   : > { %v692_v19 = vld [vmem:[%s1197_s2] ss:$0 sm:$0xff]  ;;  %v855_v27 = vld [vmem:[%s1200_s5 + $0x8] sm:$0xff]  }
  0x48   : > { %740 = vmatpush3.bf16.msra.mxu0 %v840_v2  ;;  %748 = vmatpush3.bf16.msra.mxu1 %v842_v6  ;;  %v856_v28 = vld [vmem:[%s1200_s5] sm:$0xff]  }
  0x49   : > { %765 = vmatprep.subr.bf16.mxu0 %v955_v0  ;;  %749 = vmatprep.subr.bf16.mxu1 %v955_v0  ;;  %v696_v29 = vld [vmem:[%s1199_s4] ss:$0 sm:$0xff] }
  0x4a   : > { %v705_v37 = vld [vmem:[%s1201_s6] ss:$0 sm:$0xff] }
  0x4b   : > { %742 = vmatmul.mubr.msk.bf16.vlgmr.msra.gmra.mxu0 %vm335_vm1, %v311_v5 }
  0x4c   : > { %781 = vmatprep.mubr.msk.bf16.mxu0 %vm956_vm0, %v955_v0  ;;  %750 = vmatpush3.bf16.msra.mxu1 %v843_v7 }
  0x4d   : > { %751 = vmatprep.subr.bf16.mxu1 %v955_v0  ;;  %766 = vmatpush3.bf16.msra.mxu0 %v849_v13 }
  0x4e   : > { %767 = vmatprep.subr.bf16.mxu0 %v955_v0 }
  0x50   : > { %752 = vmatpush3.bf16.msra.mxu1 %v844_v8 }
  0x51   : > { %753 = vmatprep.subr.bf16.mxu1 %v955_v0  ;;  %768 = vmatpush3.bf16.msra.mxu0 %v850_v14 }
  0x52   : > { %769 = vmatprep.subr.bf16.mxu0 %v955_v0 }
  0x54   : > { %754 = vmatpush3.bf16.msra.mxu1 %v845_v9 }
  0x55   : > { %755 = vmatprep.subr.bf16.mxu1 %v955_v0  ;;  %770 = vmatpush3.bf16.msra.mxu0 %v851_v15 }
  0x56   : > { %771 = vmatprep.subr.bf16.mxu0 %v955_v0 }
  0x58   : > { %756 = vmatpush3.bf16.msra.mxu1 %v846_v10 }
  0x59   : > { %757 = vmatprep.subr.bf16.mxu1 %v955_v0  ;;  %772 = vmatpush3.bf16.msra.mxu0 %v852_v16 }
  0x5a   : > { %773 = vmatprep.subr.bf16.mxu0 %v955_v0 }
  0x5c   : > { %758 = vmatpush3.bf16.msra.mxu1 %v847_v11 }
  0x5d   : > { %759 = vmatprep.subr.bf16.mxu1 %v955_v0  ;;  %774 = vmatpush3.bf16.msra.mxu0 %v853_v17 }
  0x5e   : > { %775 = vmatprep.subr.bf16.mxu0 %v955_v0 }
  0x60   : > { %760 = vmatpush3.bf16.msra.mxu1 %v848_v12 }
  0x61   : > { %776 = vmatpush3.bf16.msra.mxu0 %v854_v18 }
  0x62   : > { %777 = vmatprep.subr.bf16.mxu0 %v955_v0 }
  0x65   : > { %778 = vmatpush3.bf16.msra.mxu0 %v855_v27 }
  0x66   : > { %779 = vmatprep.subr.bf16.mxu0 %v955_v0 }
  0x69   : > { %780 = vmatpush3.bf16.msra.mxu0 %v856_v28 }
 0x10b   : > { %v373_v20 = vpop.f32.mrf.mxu0 }
 0x10c   : > { %v374_v21 = vadd.f32 %v692_v19, %v373_v20 }
 0x10d   : > { %v743_v22 = vpop.f32.mrf.mxu0 }
 0x10e   : > { %v379_v23 = vmax.f32 %v374_v21, 0.0 }
 0x10f   : > { %v376_v24 = vpop.f32.mrf.mxu0 }
 0x110   : > { %v380_v25 = vpack.c.bf16 %v379_v23, %v379_v23 }
 0x111   : > { %v744_v26 = vpop.f32.mrf.mxu0 }
 0x112   : > { %762 = vmatmul.mubr.bf16.vlgmr.msra.gmra.mxu1 %v380_v25 }
 0x1d2   : > { %v486_v30 = vpop.f32.mrf.mxu1 }
 0x1d3   : > { %v487_v31 = vadd.f32 %v696_v29, %v486_v30 }
 0x1d4   : > { %v763_v32 = vpop.f32.mrf.mxu1 }
 0x1d5   : > { %v492_v33 = vmax.f32 %v487_v31, 0.0 }
 0x1d6   : > { %v489_v34 = vpop.f32.mrf.mxu1 }
 0x1d7   : > { %v493_v35 = vpack.c.bf16 %v492_v33, %v492_v33 }
 0x1d8   : > { %v764_v36 = vpop.f32.mrf.mxu1 }
 0x1d9   : > { %782 = vmatmul.mubr.bf16.vlgmr.msra.gmra.mxu0 %v493_v35 }
 0x299   : > { %v599_v38 = vpop.f32.mrf.mxu0 }
 0x29a   : > { %v600_v39 = vadd.f32 %v705_v37, %v599_v38 }
 0x29b   : > { %v783_v40 = vpop.f32.mrf.mxu0 }
 0x29c   : > { %606 = vst.msk [vmem:[%s308_s12] sm:$0xff] %vm605_vm2, %v600_v39 }
 0x29d   : > { %v602_v41 = vpop.f32.mrf.mxu0 }
 0x29f   : > { %v784_v42 = vpop.f32.mrf.mxu0 }
 0x2a0 PF: > { %p18_p7 = scmp.ge.s32.totalorder %s1041_s11, 4   ;;  %s1214_s24 = smov %s941_s25 }
 0x2a1   : > { %s1215_s25 = smov %s945_s26  ;;  %s1216_s26 = smov %s1058_s19 }
 0x2a2   : > { %s1217_s27 = smov %s1041_s11  ;;  %20 = sbr.rel (!%p18_p7) target bundleno = 4 (0x4), region = 92 }
 0x2a7   :  { %626 = vsyncpa [#allocation3], 1 }
 0x2a8   :  { %628 = vsyncpa [#allocation3 + $0x1], 1 }
 0x2a9   :  { %629 = vsyncpa [#allocation5], 1 }

</bundles_post_ra>
